<compile_context>
chip_gen: v7x
topology: tpu7x:2x2x1
jax: 0.10.0
libtpu: 0.0.40
codegen_flags: <defaults>
</compile_context>

<pallas_src>
import functools

import jax
import jax.numpy as jnp
from jax.experimental import pallas as pl
from jax.experimental.pallas import tpu as pltpu


def _tsa_corr_kernel(w_ref,      # VMEM (C, A)     fc weight, resident across the grid
                     cv_ref,     # VMEM (1, A, A)  covariance_target[k]
                     ms_ref,     # VMEM (1, 1, A)  mean_source[k]
                     mt_ref,     # VMEM (1, 1, A)  mean_target[k]
                     corr_ref):  # VMEM (1, C, 1)  un-scaled per-class correction
    k = pl.program_id(0)
    w = w_ref[...]                                    # (C, A)
    wk = w_ref[pl.ds(k, 1), :]                        # (1, A)  weight row of class k
    d = w - wk                                        # (C, A)  D_k = W - W[k]

    m = jnp.dot(d, cv_ref[0], preferred_element_type=jnp.float32)   # (C, A) = D_k @ CV_k
    sigma2 = jnp.sum(m * d, axis=-1, keepdims=True)                  # (C, 1) diag(D CV D^T)

    delta = mt_ref[0] - ms_ref[0]                                    # (1, A)
    dmean = jnp.sum(d * delta, axis=-1, keepdims=True)               # (C, 1) D_k @ deltaMean

    # Lambda is factored out and applied once in the wrapper: corr = lam * (0.5*sigma2 + dmean)
    corr_ref[...] = (0.5 * sigma2 + dmean).reshape(1, -1, 1)


def _tsa_ce_kernel(n_valid,      # static python int: number of real (un-padded) samples
                   lbl_ref,      # VMEM (TB, 1) int32  labels for this sample block
                   y_ref,        # VMEM (TB, C)        logits y_s for this block
                   corr_ref,     # VMEM (K, C)         per-class corrections (resident)
                   out_ref):     # VMEM (1, 1, 1)      this block's partial loss sum
    tb, c = y_ref.shape
    blk = pl.program_id(0)

    lbl = lbl_ref[...]                                               # (TB, 1)
    cls = jax.lax.broadcasted_iota(jnp.int32, (tb, c), 1)            # class idx on lanes
    oh = (cls == lbl).astype(jnp.float32)                            # (TB, C) one-hot

    # Gather corr[label] for the whole block via one small MXU matmul (K == C here).
    aug = y_ref[...] + jnp.dot(oh, corr_ref[...],
                               preferred_element_type=jnp.float32)   # (TB, C)

    # Row-wise (lane-axis) cross entropy: logsumexp(aug) - aug[label].
    mx = jnp.max(aug, axis=-1, keepdims=True)                        # (TB, 1)
    lse = mx + jnp.log(jnp.sum(jnp.exp(aug - mx), axis=-1, keepdims=True))
    aug_lbl = jnp.sum(aug * oh, axis=-1, keepdims=True)              # (TB, 1)

    # Mask padded rows (block may overhang N).
    row = blk * tb + jax.lax.broadcasted_iota(jnp.int32, (tb, 1), 0)
    loss = jnp.where(row < n_valid, lse - aug_lbl, 0.0)              # (TB, 1)

    out_ref[...] = jnp.sum(loss, axis=0, keepdims=True).reshape(1, 1, 1)


def tsa_loss_pallas(weight, features_source, y_s, labels, lam,
                    mean_source, mean_target, covariance_target):
    del features_source  # unused by the reference module's forward (dead plumbing)
    n, _ = y_s.shape
    c, a = weight.shape
    k = covariance_target.shape[0]   # == class_num in the module

    w = weight.astype(jnp.float32)
    cv = covariance_target.astype(jnp.float32)
    ms = mean_source.astype(jnp.float32).reshape(k, 1, a)
    mt = mean_target.astype(jnp.float32).reshape(k, 1, a)

    # ---- Phase 1: per-class correction vectors (grid over K classes). ----
    corr_raw = pl.pallas_call(
        _tsa_corr_kernel,
        out_shape=jax.ShapeDtypeStruct((k, c, 1), jnp.float32),
        grid_spec=pltpu.PrefetchScalarGridSpec(
            num_scalar_prefetch=0,
            grid=(k,),
            in_specs=[
                pl.BlockSpec((c, a), lambda i: (0, 0)),          # weight (resident)
                pl.BlockSpec((1, a, a), lambda i: (i, 0, 0)),    # covariance_target[k]
                pl.BlockSpec((1, 1, a), lambda i: (i, 0, 0)),    # mean_source[k]
                pl.BlockSpec((1, 1, a), lambda i: (i, 0, 0)),    # mean_target[k]
            ],
            out_specs=pl.BlockSpec((1, c, 1), lambda i: (i, 0, 0)),
        ),
        compiler_params=pltpu.CompilerParams(dimension_semantics=("parallel",)),
    )(w, cv, ms, mt)
    corr = jnp.float32(lam) * corr_raw[:, :, 0]                  # (K, C)

    # ---- Phase 2: blocked cross entropy over samples, per-block partial sums. ----
    tb = min(128, ((n + 7) // 8) * 8)                            # samples per grid step
    n_pad = ((n + tb - 1) // tb) * tb
    num_blocks = n_pad // tb
    y_pad = jnp.zeros((n_pad, c), jnp.float32).at[:n].set(y_s.astype(jnp.float32))
    lbl_pad = jnp.zeros((n_pad, 1), jnp.int32).at[:n, 0].set(labels.astype(jnp.int32))

    partials = pl.pallas_call(
        functools.partial(_tsa_ce_kernel, n),
        out_shape=jax.ShapeDtypeStruct((num_blocks, 1, 1), jnp.float32),
        grid_spec=pltpu.PrefetchScalarGridSpec(
            num_scalar_prefetch=0,
            grid=(num_blocks,),
            in_specs=[
                pl.BlockSpec((tb, 1), lambda i: (i, 0)),         # labels block
                pl.BlockSpec((tb, c), lambda i: (i, 0)),         # y_s block (lane-dense)
                pl.BlockSpec((k, c), lambda i: (0, 0)),          # corr (resident)
            ],
            out_specs=pl.BlockSpec((1, 1, 1), lambda i: (i, 0, 0)),
        ),
        compiler_params=pltpu.CompilerParams(dimension_semantics=("parallel",)),
    )(lbl_pad, y_pad, corr)

    return jnp.sum(partials) / jnp.float32(n)   # mean applied once, not per step


def tsa_loss_ref(weight, features_source, y_s, labels, lam,
                 mean_source, mean_target, covariance_target):
    """Pure-JAX reference mirroring the PyTorch semantics."""
    n, a = features_source.shape
    c = weight.shape[0]
    w_exp = jnp.broadcast_to(weight[None], (n, c, a))
    w_k = weight[labels][:, None, :]
    d = w_exp - w_k
    cv = covariance_target[labels]
    sigma2 = lam * jnp.einsum('nca,nab,ncb->nc', d, cv, d)
    delta = (mean_target - mean_source)[labels]
    dm = jnp.einsum('nca,na->nc', d, delta)
    aug = y_s + 0.5 * sigma2 + lam * dm
    lse = jax.scipy.special.logsumexp(aug, axis=1)
    nll = lse - jnp.take_along_axis(aug, labels[:, None], axis=1)[:, 0]
    return jnp.mean(nll)


if __name__ == "__main__":
    # Small shapes consistent with the module: N samples, C classes, A features.
    N, C, A = 8, 4, 32
    key = jax.random.PRNGKey(0)
    ks = jax.random.split(key, 7)

    fc_weight = 0.1 * jax.random.normal(ks[0], (C, A), jnp.float32)
    features_source = jax.random.normal(ks[1], (N, A), jnp.float32)
    y_s = jax.random.normal(ks[2], (N, C), jnp.float32)
    labels_source = jax.random.randint(ks[3], (N,), 0, C, jnp.int32)
    mean_source = jax.random.normal(ks[4], (C, A), jnp.float32)
    mean_target = jax.random.normal(ks[5], (C, A), jnp.float32)
    cov_raw = 0.1 * jax.random.normal(ks[6], (C, A, A), jnp.float32)
    covariance_target = jnp.einsum('kab,kcb->kac', cov_raw, cov_raw)  # symmetric PSD
    Lambda = 0.25

    loss = tsa_loss_pallas(fc_weight, features_source, y_s, labels_source,
                           Lambda, mean_source, mean_target, covariance_target)
    loss = jax.block_until_ready(loss)

    ref = tsa_loss_ref(fc_weight, features_source, y_s, labels_source,
                       Lambda, mean_source, mean_target, covariance_target)
    assert jnp.allclose(loss, ref, rtol=1e-2, atol=1e-2), (float(loss), float(ref))
    print("KERNEL_OK")
</pallas_src>

<mosaic_0001>
module attributes {stable_mosaic.version = 11 : i64} {
  func.func @_tsa_corr_kernel(%arg0: i32, %arg1: memref<4x32xf32, #tpu.memory_space<vmem>>, %arg2: memref<1x32x32xf32, #tpu.memory_space<vmem>>, %arg3: memref<1x1x32xf32, #tpu.memory_space<vmem>>, %arg4: memref<1x1x32xf32, #tpu.memory_space<vmem>>, %arg5: memref<1x4x1xf32, #tpu.memory_space<vmem>>) attributes {dimension_semantics = [#tpu.dimension_semantics<parallel>], iteration_bounds = array<i64: 4>, scalar_prefetch = 0 : i64, scratch_operands = 0 : i64, tpu.core_type = #tpu.core_type<tc>, window_params = [{pipeline_mode = #tpu.pipeline_mode<synchronous>, transform_indices = @transform_0, window_bounds = array<i64: 4, 32>}, {transform_indices = @transform_1, window_bounds = array<i64: 1, 32, 32>}, {transform_indices = @transform_2, window_bounds = array<i64: 1, 1, 32>}, {transform_indices = @transform_3, window_bounds = array<i64: 1, 1, 32>}, {transform_indices = @transform_4, window_bounds = array<i64: 1, 4, 1>}]} {
    %c0 = arith.constant 0 : index
    %c0_0 = arith.constant 0 : index
    %0 = vector.load %arg1[%c0, %c0_0] : memref<4x32xf32, #tpu.memory_space<vmem>>, vector<4x32xf32>
    %1 = arith.index_cast %arg0 : i32 to index
    %c0_1 = arith.constant 0 : index
    %2 = vector.load %arg1[%1, %c0_1] : memref<4x32xf32, #tpu.memory_space<vmem>>, vector<1x32xf32>
    %3 = vector.broadcast %2 : vector<1x32xf32> to vector<4x32xf32>
    %4 = arith.subf %0, %3 : vector<4x32xf32>
    %c0_2 = arith.constant 0 : index
    %c0_3 = arith.constant 0 : index
    %c0_4 = arith.constant 0 : index
    %5 = vector.load %arg2[%c0_2, %c0_3, %c0_4] : memref<1x32x32xf32, #tpu.memory_space<vmem>>, vector<1x32x32xf32>
    %6 = vector.shape_cast %5 : vector<1x32x32xf32> to vector<32x32xf32>
    %cst = arith.constant dense<0.000000e+00> : vector<4x32xf32>
    %7 = tpu.matmul %4, %6, %cst {dimension_numbers = #tpu.dot_dimension_numbers<[1], [0], [0], [1], [0, 0, 1, 1], [], []>} : vector<4x32xf32>, vector<32x32xf32>, vector<4x32xf32> -> vector<4x32xf32>
    %8 = arith.mulf %7, %4 : vector<4x32xf32>
    %cst_5 = arith.constant dense<0.000000e+00> : vector<4xf32>
    %9 = vector.multi_reduction <add>, %8, %cst_5 [1] : vector<4x32xf32> to vector<4xf32>
    %10 = vector.shape_cast %9 : vector<4xf32> to vector<4x1xf32>
    %c0_6 = arith.constant 0 : index
    %c0_7 = arith.constant 0 : index
    %c0_8 = arith.constant 0 : index
    %11 = vector.load %arg4[%c0_6, %c0_7, %c0_8] : memref<1x1x32xf32, #tpu.memory_space<vmem>>, vector<1x1x32xf32>
    %12 = vector.shape_cast %11 : vector<1x1x32xf32> to vector<1x32xf32>
    %c0_9 = arith.constant 0 : index
    %c0_10 = arith.constant 0 : index
    %c0_11 = arith.constant 0 : index
    %13 = vector.load %arg3[%c0_9, %c0_10, %c0_11] : memref<1x1x32xf32, #tpu.memory_space<vmem>>, vector<1x1x32xf32>
    %14 = vector.shape_cast %13 : vector<1x1x32xf32> to vector<1x32xf32>
    %15 = arith.subf %12, %14 : vector<1x32xf32>
    %16 = vector.broadcast %15 : vector<1x32xf32> to vector<4x32xf32>
    %17 = arith.mulf %4, %16 : vector<4x32xf32>
    %cst_12 = arith.constant dense<0.000000e+00> : vector<4xf32>
    %18 = vector.multi_reduction <add>, %17, %cst_12 [1] : vector<4x32xf32> to vector<4xf32>
    %19 = vector.shape_cast %18 : vector<4xf32> to vector<4x1xf32>
    %cst_13 = arith.constant 5.000000e-01 : f32
    %20 = vector.broadcast %cst_13 : f32 to vector<4x1xf32>
    %21 = arith.mulf %20, %10 : vector<4x1xf32>
    %22 = arith.addf %21, %19 : vector<4x1xf32>
    %23 = vector.shape_cast %22 : vector<4x1xf32> to vector<1x4x1xf32>
    %c0_14 = arith.constant 0 : index
    %c0_15 = arith.constant 0 : index
    %c0_16 = arith.constant 0 : index
    %24 = vector.load %arg5[%c0_14, %c0_15, %c0_16] : memref<1x4x1xf32, #tpu.memory_space<vmem>>, vector<1x4x1xf32>
    tpu.vector_store %arg5[%c0_14, %c0_15, %c0_16], %23 {strides = array<i32>} : memref<1x4x1xf32, #tpu.memory_space<vmem>>, vector<1x4x1xf32>,
    return
  }
  func.func @transform_0(%arg0: i32) -> (i32, i32) {
    %c0_i32 = arith.constant 0 : i32
    %c0_i32_0 = arith.constant 0 : i32
    %c0_i32_1 = arith.constant 0 : i32
    return %c0_i32, %c0_i32_0 : i32, i32
  }
  func.func @transform_1(%arg0: i32) -> (i32, i32, i32) {
    %c0_i32 = arith.constant 0 : i32
    %c0_i32_0 = arith.constant 0 : i32
    %c0_i32_1 = arith.constant 0 : i32
    return %arg0, %c0_i32, %c0_i32_0 : i32, i32, i32
  }
  func.func @transform_2(%arg0: i32) -> (i32, i32, i32) {
    %c0_i32 = arith.constant 0 : i32
    %c0_i32_0 = arith.constant 0 : i32
    %c0_i32_1 = arith.constant 0 : i32
    return %arg0, %c0_i32, %c0_i32_0 : i32, i32, i32
  }
  func.func @transform_3(%arg0: i32) -> (i32, i32, i32) {
    %c0_i32 = arith.constant 0 : i32
    %c0_i32_0 = arith.constant 0 : i32
    %c0_i32_1 = arith.constant 0 : i32
    return %arg0, %c0_i32, %c0_i32_0 : i32, i32, i32
  }
  func.func @transform_4(%arg0: i32) -> (i32, i32, i32) {
    %c0_i32 = arith.constant 0 : i32
    %c0_i32_0 = arith.constant 0 : i32
    %c0_i32_1 = arith.constant 0 : i32
    return %arg0, %c0_i32, %c0_i32_0 : i32, i32, i32
  }
}

</mosaic_0001>

<bundles_post_ra>
// kernel: tpu_custom_call.1
= control target key start
LH: loop header
LB: loop body
LE: loop exit
PB: predicated region body
PF: predicated region fallthrough
CT: control target
= control target key end

     0   :  { %9 = vsyncpa [#allocation3], 0  ;;  %s844_s0 = inlined_call_operand.hbm [shape: f32[4,32], index: 0, kind: input, shape index: {}]   ;;  %s845_s1 = inlined_call_operand.hbm [shape: f32[4,32,32], index: 1, kind: input, shape index: {}]   ;;  %s846_s2 = inlined_call_operand.vmem [shape: f32[4,1,32], index: 2, kind: input, shape index: {}]   ;;  %s847_s3 = inlined_call_operand.vmem [shape: f32[4,1,32], index: 3, kind: input, shape index: {}]   ;;  %s848_s4 = inlined_call_operand.vmem [shape: f32[4,4,1], index: 4, kind: output, shape index: {}]  }
   0x1   :  { %10 = vsyncpa [#allocation5], 0 }
   0x2   :  { %12 = vsyncpa [#allocation5 + $0x1], 0  ;;  %s689_s15 = smov 0   ;;  %s691_s16 = smov 0  }
   0x3   :  { %s693_s17 = smov 0   ;;  %s695_s18 = smov 0  }
   0x4 LB: > { %s708_s19 = sadd.s32 4294967295, %s655_s18   ;;  %s711_s20 = sadd.s32 1, %s655_s18   ;;  %s655_s18 = sphi %s695_s18, %s866_s18   ;;  %s651_s17 = sphi %s693_s17, %s865_s17   ;;  %s647_s16 = sphi %s691_s16, %s864_s16   ;;  %s643_s15 = sphi %s689_s15, %s863_s15  }
   0x5   : > { %s43_s21 = ssub.s32 %s655_s18, %s711_s20  ;;  %s46_s22 = sadd.s32 1, %s651_s17 }
   0x6   : > { %p44_p0 = scmp.eq.s32.totalorder %s43_s21, 0  ;;  %p53_p1 = scmp.ne.s32.totalorder %s651_s17, %s647_s16 }
   0x7   : > { %p54_p2 = scmp.eq.s32.totalorder %s655_s18, 0  ;;  %p59_p3 = scmp.ne.s32.totalorder %s647_s16, %s643_s15 }
   0x8   : > { %s721_s23 = scalar_select %p44_p0, %s651_s17, %s46_s22  }
   0x9   : > { %p723_p4 = por %p54_p2, %p53_p1  ;;  %p849_p5 = scmp.eq.s32.totalorder %s708_s19, 0 }
   0xa   : > { %p462_p6 = scmp.ge.s32.totalorder %s655_s18, 1  ;;  %p148_p7 = scmp.lt.s32.totalorder %s655_s18, 5 }
   0xb   : > { %p732_p8 = por %p849_p5, %p59_p3  ;;  %s657_s27 = smov [#allocation2]  }
   0xc   : > { %p736_p9 = pnand %p462_p6, %p148_p7  ;;  %s161_s28 = sshll.u32 %s657_s27, 4  ;;  %s162_s28 = int_to_ptr.vmem [resolvable:$true] %s161_s28 }
   0xd   : > { %s854_s25 = scalar_select %p732_p8, 1, 0 }
   0xe   : > { %s855_s26 = scalar_select %p736_p9, 1, 0 }
   0xf   : > { %p510_p10 = pneg %p736_p9  ;;  %p519_p11 = scmp.lt.s32.totalorder %s655_s18, 4 }
  0x10   : > { %s172_s29 = sand.u32 1, %s651_s17   ;;  %s559_s9 = scalar_lea.hbm %s844_s0, 64 }
  0x11   : > { %p746_p12 = pnand %p510_p10, %p849_p5  ;;  %p752_p13 = pnand %p519_p11, %p723_p4 }
  0x12   : > { %s465_s6 = sshll.u32 %s172_s29, 5  ;;  %p560_p0 = scmp.ne.s32.totalorder %s844_s0, %s559_s9 }
  0x13   : > { %s857_s5 = scalar_select %p752_p13, 1, 0 }
  0x14   : > { %p561_p1 = pneg %p746_p12  ;;  %p566_p4 = scmp.lt.u32.totalorder %s559_s9, %s844_s0 }
  0x16   : > { %p562_p2 = pnand %p561_p1, %p560_p0 }
  0x18   : > { %p563_p3 = pneg %p562_p2 }
  0x1a   : > { %p568_p6 = pnand %p566_p4, %p563_p3 }
  0x1c   : > { %571 = shalt.err (!%p568_p6)
}
  0x1d   : > { %s572_s14 = scalar_lea.vmem %s162_s28, 64  ;;  %p580_p5 = scmp.lt.s32.totalorder %s162_s28, %s162_s28 }
  0x1e   : > { %p573_p7 = scmp.ne.s32.totalorder %s162_s28, %s572_s14  ;;  %p581_p8 = scmp.lt.s32.totalorder %s572_s14, %s572_s14 }
  0x20   : > { %p575_p10 = pnand %p573_p7, %p561_p1  ;;  %p582_p9 = por %p581_p8, %p580_p5 }
  0x22   : > { %p576_p11 = pneg %p575_p10 }
  0x24   : > { %p583_p13 = pnand %p582_p9, %p576_p11 }
  0x26   : > { %586 = shalt.err (!%p583_p13)
}
  0x27   : > { %513 = dma.hbm_to_vmem [thread:$0]  (!%p746_p12), %s844_s0, 64, %s162_s28, [#allocation3]  }
  0x28   : > { %s477_s22 = sshll.u32 %s655_s18, 9  ;;  %s176_s8 = scalar_lea.vmem [#allocation4], %s465_s6 }
  0x29   : > { %s776_s7 = scalar_lea.hbm %s845_s1, %s477_s22  ;;  %s183_s9 = sshll.u32 %s176_s8, 4  ;;  %s778_s9 = int_to_ptr.vmem [resolvable:$true] %s183_s9 }
  0x2a   : > { %s780_s30 = scalar_lea.sflag [#allocation5], %s172_s29  ;;  %s587_s10 = scalar_lea.hbm %s776_s7, 512 }
  0x2b   : > { %p588_p5 = scmp.ne.s32.totalorder %s776_s7, %s587_s10  ;;  %p858_p8 = scmp.ne.s32.totalorder %s857_s5, 0 }
  0x2c   : > { %s592_s12 = scalar_lea.hbm %s845_s1, 2048  ;;  %p593_p0 = scmp.lt.u32.totalorder %s776_s7, %s845_s1 }
  0x2d   : > { %p589_p9 = pneg %p858_p8  ;;  %p594_p1 = scmp.lt.u32.totalorder %s592_s12, %s587_s10 }
  0x2e   : > { %p596_p3 = scmp.lt.u32.totalorder %s587_s10, %s776_s7 }
  0x2f   : > { %p590_p12 = pnand %p589_p9, %p588_p5  ;;  %p595_p2 = por %p594_p1, %p593_p0 }
  0x31   : > { %p591_p13 = pneg %p590_p12  ;;  %p597_p4 = por %p596_p3, %p595_p2 }
  0x33   : > { %p598_p6 = pnand %p597_p4, %p591_p13 }
  0x35   : > { %601 = shalt.err (!%p598_p6)
}
  0x36   : > { %s602_s29 = scalar_lea.vmem %s778_s9, 512  ;;  %s658_s6 = smov [#allocation4]  }
  0x37   : > { %p603_p7 = scmp.ne.s32.totalorder %s778_s9, %s602_s29  ;;  %s607_s15 = sshll.u32 %s658_s6, 4  ;;  %s608_s15 = int_to_ptr.vmem [resolvable:$false] %s607_s15 }
  0x38   : > { %s609_s21 = scalar_lea.vmem %s608_s15, 1024  ;;  %p610_p5 = scmp.lt.s32.totalorder %s778_s9, %s608_s15 }
  0x39   : > { %p605_p10 = pnand %p603_p7, %p589_p9  ;;  %p611_p12 = scmp.lt.s32.totalorder %s609_s21, %s602_s29 }
  0x3b   : > { %p606_p11 = pneg %p605_p10  ;;  %p612_p0 = por %p611_p12, %p610_p5 }
  0x3d   : > { %p613_p1 = pnand %p612_p0, %p606_p11 }
  0x3f   : > { %616 = shalt.err (!%p613_p1)
}
  0x40   : > { %s659_s22 = smov 128   ;;  %s660_s24 = smov 8  }
  0x41   : > { %517 = dma.hbm_to_vmem [thread:$0]  (!%p858_p8), %s776_s7, 512, %s778_s9, %s780_s30, %s659_s22, %s659_s22, %s660_s24  }
  0x42   : > { %p859_p9 = scmp.ne.s32.totalorder %s855_s26, 0 }
  0x43   : > { %p860_p13 = scmp.eq.s32.totalorder (!%p859_p9), %s708_s19, 0 }
  0x44   : > { %207 = sbr.rel (%p859_p9) target bundleno = 454 (0x1c6), region = 36 }
  0x4b   : > { %634 = dma.done.wait (%p860_p13), [#allocation3], 64   ;;  %p861_p2 = pmov %p860_p13 }
  0x4c   : > { %s213_s27 = sand.u32 1, %s647_s16   ;;  %p862_p3 = scmp.ne.s32.totalorder %s854_s25, 0 }
  0x4d   : > { %636 = vsyncadd (%p861_p2), [#allocation3], 4294967232  ;;  %s470_s8 = sshll.u32 %s213_s27, 5  ;;  %s214_s10 = scalar_lea.sflag [#allocation5], %s213_s27 }
  0x4e   : > { %s217_s28 = scalar_lea.vmem [#allocation4], %s470_s8 }
  0x4f   : > { %638 = dma.done.wait (%p862_p3), %s214_s10, 512  }
  0x50   : > { %640 = vsyncadd (%p862_p3), %s214_s10, 4294966784  ;;  %v661_v0 = vmov 0.0|0.0   ;;  %vm662_vm0 = vmmov 0   ;;  %v663_v1 = vmov 0.0   ;;  %v265_v2 = vld [vmem:[%s217_s28] sm:$0xff]  ;;  %v266_v3 = vld [vmem:[%s217_s28 + $0x8] sm:$0xff]  ;;  %v352_v11 = vlaneseq }
  0x51   : > { %498 = vmatprep.subr.bf16.mxu0 %v661_v0  ;;  %495 = vmatprep.mubr.msk.f32.mxu0 %vm662_vm0, %v663_v1  ;;  %v267_v4 = vld [vmem:[%s217_s28 + $0x10] sm:$0xff]  ;;  %v499_v5 = vpack.c.bf16 %v266_v3, %v265_v2  ;;  %v268_v6 = vld [vmem:[%s217_s28 + $0x18] sm:$0xff]  ;;  %s478_s26 = scalar_lea.vmem [#allocation2], %s655_s18  ;;  %vm269_vm1 = vcmask 261120   ;;  %p247_p8 = scmp.lt.s32.totalorder %s708_s19, 3  ;;  %vm344_vm2 = vcmask 257024  }
  0x52   : > { %v502_v7 = vpack.c.bf16 %v268_v6, %v267_v4  ;;  %v257_v8 = vld [vmem:[#allocation2] sm:$0xf]  ;;  %v481_v9 = vld [vmem:[%s478_s26 - $0x1] ss:$0 sm:$0xff]  ;;  %v353_v12 = vshrl.u32 %v352_v11, 7  ;;  %vm363_vm3 = vcmask 3072  }
  0x53   : > { %500 = vmatpush3.bf16.msra.mxu0 %v499_v5  ;;  %v264_v10 = vsub.f32 %v257_v8, %v481_v9  ;;  %s868_s19 = smov (!%p247_p8, %s708_s19), 3 }
  0x54   : > { %501 = vmatprep.subr.bf16.mxu0 %v661_v0  ;;  %s249_s7 = scalar_lea.vmem %s846_s2, %s868_s19  ;;  %s252_s11 = scalar_lea.vmem %s847_s3, %s868_s19  ;;  %v354_v16 = vsub.s32 0, %v353_v12 }
  0x55   : > { %v348_v13 = vld [vmem:[%s252_s11] sm:$0x1]  ;;  %s471_s18 = sshll.u32 %s868_s19, 2 }
  0x56   : > { %v349_v14 = vld [vmem:[%s249_s7] sm:$0x1]  ;;  %s256_s14 = scalar_lea.vmem %s848_s4, %s471_s18 }
  0x57   : > { %503 = vmatpush3.bf16.msra.mxu0 %v502_v7  ;;  %v350_v15 = vsub.f32 %v348_v13, %v349_v14 }
  0x59   : > { %v355_v17 = vrot.slane %v350_v15, %v354_v16 }
  0x5a   : > { %496 = vmatmul.mubr.msk.f32.vlgmr.msra.gmra.mrb[0].mxu0 %vm269_vm1, %v264_v10 }
  0x5b   : > { %v357_v21 = vmul.f32 %v355_v17, %v264_v10 }
  0x5d   : > { %v358_v23 = vsel %vm344_vm2, %v357_v21, 0.0 }
 0x12d   : > { %v339_v18 = vpop.f32.mrb[0].mxu0 }
 0x12e   : > { %v343_v19 = vmul.f32 %v339_v18, %v264_v10  ;;  %v497_v20 = vpop.f32.mrb[1].mxu0 }
 0x130   : > { %v345_v22 = vsel %vm344_vm2, %v343_v19, 0.0 }
 0x131   : > { %346 = vadd.xlane.f32.xlu0 %v345_v22 }
 0x135   : > { %359 = vadd.xlane.f32.xlu0 %v358_v23 }
 0x1be   : > { %v347_v24 = vpop.xlane.xlu0 %346 }
 0x1bf   : > { %v361_v25 = vmul.f32 0.5, %v347_v24 }
 0x1c2   : > { %v360_v26 = vpop.xlane.xlu0 %359 }
 0x1c3   : > { %v362_v27 = vadd.f32 %v361_v25, %v360_v26 }
 0x1c5   : > { %364 = vst.msk [vmem:[%s256_s14] sm:$0xf] %vm363_vm3, %v362_v27 }
 0x1c6 PF: > { %p15_p4 = scmp.ge.s32.totalorder %s711_s20, 6   ;;  %s863_s15 = smov %s647_s16 }
 0x1c7   : > { %s864_s16 = smov %s651_s17  ;;  %s865_s17 = smov %s721_s23 }
 0x1c8   : > { %s866_s18 = smov %s711_s20  ;;  %17 = sbr.rel (!%p15_p4) target bundleno = 4 (0x4), region = 88 }
 0x1cf   :  { %384 = vsyncpa [#allocation3], 1 }
 0x1d0   :  { %386 = vsyncpa [#allocation3 + $0x1], 1 }
 0x1d1   :  { %387 = vsyncpa [#allocation5], 1 }
 0x1d2   :  { %389 = vsyncpa [#allocation5 + $0x1], 1 }

</bundles_post_ra>
